<compile_context>
chip_gen: v7x
topology: tpu7x:2x2x1
jax: 0.10.0
libtpu: 0.0.40
codegen_flags: <defaults>
</compile_context>

<pallas_src>
import functools

import jax
import jax.numpy as jnp
from jax.experimental import pallas as pl
from jax.experimental.pallas import tpu as pltpu

NUM_OBJS = 8          # number of object classes -> table has NUM_OBJS**2 rows
NUM_RELS = 128        # number of relation classes (lane-dense)
BATCH = 8             # number of object pairs
TILE_B = 8            # batch rows per grid step (one full (8,128) vreg)


def _freq_bias_kernel(pair_idx_ref, table_ref, out_ref, *, tile_b):
    # pair_idx_ref: (B_pad,) int32, SMEM (scalar prefetch)
    # table_ref:    (num_pairs, num_rels) embedding table, resident in VMEM
    # out_ref:      (tile_b, num_rels) output block for this grid step
    base = pl.program_id(0) * tile_b
    # Gather tile_b rows from the resident table (dynamic sublane slices),
    # assemble them in registers, and emit ONE unmasked (tile_b, num_rels)
    # store instead of tile_b masked single-row stores.
    rows = [
        table_ref[pl.ds(pair_idx_ref[base + r], 1), :]
        for r in range(tile_b)
    ]
    out_ref[...] = jnp.concatenate(rows, axis=0)


def freq_bias_forward(obj_pair_labels, table, *, num_objs, tile_b=TILE_B):
    """obj_pair_labels: (B, 2) int32; table: (num_objs**2, R) f32 -> (B, R)."""
    B = obj_pair_labels.shape[0]
    num_pairs, num_rels = table.shape

    # glue: pair-index arithmetic + clamp (out-of-range labels must not drive
    # an OOB VMEM read inside the kernel)
    pair_idx = (obj_pair_labels[:, 0].astype(jnp.int32) * num_objs
                + obj_pair_labels[:, 1].astype(jnp.int32))
    pair_idx = jnp.clip(pair_idx, 0, num_pairs - 1)

    # pad batch up to a multiple of the 8-row tile so every output block is a
    # full (8, num_rels) slab
    b_pad = pl.cdiv(B, tile_b) * tile_b
    if b_pad != B:
        pair_idx = jnp.pad(pair_idx, (0, b_pad - B))

    grid_spec = pltpu.PrefetchScalarGridSpec(
        num_scalar_prefetch=1,
        grid=(b_pad // tile_b,),
        in_specs=[
            # whole embedding table resident in VMEM across all grid steps
            # (32 KiB here; production 151^2 x 64-padded rels still fits)
            pl.BlockSpec((num_pairs, num_rels), lambda i, idx_ref: (0, 0)),
        ],
        out_specs=pl.BlockSpec((tile_b, num_rels), lambda i, idx_ref: (i, 0)),
    )

    kernel = functools.partial(_freq_bias_kernel, tile_b=tile_b)
    out = pl.pallas_call(
        kernel,
        out_shape=jax.ShapeDtypeStruct((b_pad, num_rels), table.dtype),
        grid_spec=grid_spec,
        compiler_params=pltpu.CompilerParams(
            dimension_semantics=("parallel",)),  # independent batch tiles
    )(pair_idx, table)
    return out[:B]


def make_parameters(key, num_objs, num_rels):
    """Deterministic synthetic statistics['pred_dist'] -> embedding table,
    mirroring FrequencyBias.__init__ (per-pair log relation distribution)."""
    fg = jax.random.randint(key, (num_objs, num_objs, num_rels), 0, 50)
    fg = fg.astype(jnp.float32)
    fg = fg.at[:, :, 0].set(0.0)
    pred_dist = jnp.log((fg + 1.0) / (fg + 1.0).sum(-1, keepdims=True))
    return pred_dist.reshape(num_objs * num_objs, num_rels)


if __name__ == "__main__":
    key = jax.random.PRNGKey(0)
    k_params, k_labels = jax.random.split(key)

    table = make_parameters(k_params, NUM_OBJS, NUM_RELS)
    obj_pair_labels = jax.random.randint(
        k_labels, (BATCH, 2), 0, NUM_OBJS).astype(jnp.int32)

    out = freq_bias_forward(obj_pair_labels, table, num_objs=NUM_OBJS)
    out = jax.block_until_ready(out)

    # pure-JAX reference
    pair_idx = obj_pair_labels[:, 0] * NUM_OBJS + obj_pair_labels[:, 1]
    ref = table[pair_idx]
    assert out.shape == (BATCH, NUM_RELS)
    assert jnp.allclose(out, ref, atol=1e-6, rtol=1e-6)

    print("KERNEL_OK")
</pallas_src>

<mosaic_0001>
module attributes {stable_mosaic.version = 11 : i64} {
  func.func @_freq_bias_kernel(%arg0: i32, %arg1: memref<8xi32, #tpu.memory_space<smem>>, %arg2: memref<64x128xf32, #tpu.memory_space<vmem>>, %arg3: memref<8x128xf32, #tpu.memory_space<vmem>>) attributes {dimension_semantics = [#tpu.dimension_semantics<parallel>], iteration_bounds = array<i64: 1>, scalar_prefetch = 1 : i64, scratch_operands = 0 : i64, tpu.core_type = #tpu.core_type<tc>, window_params = [{pipeline_mode = #tpu.pipeline_mode<synchronous>, transform_indices = @transform_0, window_bounds = array<i64: 64, 128>}, {transform_indices = @transform_1, window_bounds = array<i64: 8, 128>}]} {
    %c8_i32 = arith.constant 8 : i32
    %0 = arith.muli %arg0, %c8_i32 : i32
    %c0_i32 = arith.constant 0 : i32
    %1 = arith.addi %0, %c0_i32 : i32
    %2 = arith.index_cast %1 : i32 to index
    %3 = memref.load %arg1[%2] : memref<8xi32, #tpu.memory_space<smem>>
    %4 = arith.index_cast %3 : i32 to index
    %c0 = arith.constant 0 : index
    %5 = vector.load %arg2[%4, %c0] : memref<64x128xf32, #tpu.memory_space<vmem>>, vector<1x128xf32>
    %c1_i32 = arith.constant 1 : i32
    %6 = arith.addi %0, %c1_i32 : i32
    %7 = arith.index_cast %6 : i32 to index
    %8 = memref.load %arg1[%7] : memref<8xi32, #tpu.memory_space<smem>>
    %9 = arith.index_cast %8 : i32 to index
    %c0_0 = arith.constant 0 : index
    %10 = vector.load %arg2[%9, %c0_0] : memref<64x128xf32, #tpu.memory_space<vmem>>, vector<1x128xf32>
    %c2_i32 = arith.constant 2 : i32
    %11 = arith.addi %0, %c2_i32 : i32
    %12 = arith.index_cast %11 : i32 to index
    %13 = memref.load %arg1[%12] : memref<8xi32, #tpu.memory_space<smem>>
    %14 = arith.index_cast %13 : i32 to index
    %c0_1 = arith.constant 0 : index
    %15 = vector.load %arg2[%14, %c0_1] : memref<64x128xf32, #tpu.memory_space<vmem>>, vector<1x128xf32>
    %c3_i32 = arith.constant 3 : i32
    %16 = arith.addi %0, %c3_i32 : i32
    %17 = arith.index_cast %16 : i32 to index
    %18 = memref.load %arg1[%17] : memref<8xi32, #tpu.memory_space<smem>>
    %19 = arith.index_cast %18 : i32 to index
    %c0_2 = arith.constant 0 : index
    %20 = vector.load %arg2[%19, %c0_2] : memref<64x128xf32, #tpu.memory_space<vmem>>, vector<1x128xf32>
    %c4_i32 = arith.constant 4 : i32
    %21 = arith.addi %0, %c4_i32 : i32
    %22 = arith.index_cast %21 : i32 to index
    %23 = memref.load %arg1[%22] : memref<8xi32, #tpu.memory_space<smem>>
    %24 = arith.index_cast %23 : i32 to index
    %c0_3 = arith.constant 0 : index
    %25 = vector.load %arg2[%24, %c0_3] : memref<64x128xf32, #tpu.memory_space<vmem>>, vector<1x128xf32>
    %c5_i32 = arith.constant 5 : i32
    %26 = arith.addi %0, %c5_i32 : i32
    %27 = arith.index_cast %26 : i32 to index
    %28 = memref.load %arg1[%27] : memref<8xi32, #tpu.memory_space<smem>>
    %29 = arith.index_cast %28 : i32 to index
    %c0_4 = arith.constant 0 : index
    %30 = vector.load %arg2[%29, %c0_4] : memref<64x128xf32, #tpu.memory_space<vmem>>, vector<1x128xf32>
    %c6_i32 = arith.constant 6 : i32
    %31 = arith.addi %0, %c6_i32 : i32
    %32 = arith.index_cast %31 : i32 to index
    %33 = memref.load %arg1[%32] : memref<8xi32, #tpu.memory_space<smem>>
    %34 = arith.index_cast %33 : i32 to index
    %c0_5 = arith.constant 0 : index
    %35 = vector.load %arg2[%34, %c0_5] : memref<64x128xf32, #tpu.memory_space<vmem>>, vector<1x128xf32>
    %c7_i32 = arith.constant 7 : i32
    %36 = arith.addi %0, %c7_i32 : i32
    %37 = arith.index_cast %36 : i32 to index
    %38 = memref.load %arg1[%37] : memref<8xi32, #tpu.memory_space<smem>>
    %39 = arith.index_cast %38 : i32 to index
    %c0_6 = arith.constant 0 : index
    %40 = vector.load %arg2[%39, %c0_6] : memref<64x128xf32, #tpu.memory_space<vmem>>, vector<1x128xf32>
    %41 = tpu.concatenate %5, %10, %15, %20, %25, %30, %35, %40 in 0 : vector<1x128xf32>, vector<1x128xf32>, vector<1x128xf32>, vector<1x128xf32>, vector<1x128xf32>, vector<1x128xf32>, vector<1x128xf32>, vector<1x128xf32> -> vector<8x128xf32>
    %c0_7 = arith.constant 0 : index
    %c0_8 = arith.constant 0 : index
    %42 = vector.load %arg3[%c0_7, %c0_8] : memref<8x128xf32, #tpu.memory_space<vmem>>, vector<8x128xf32>
    tpu.vector_store %arg3[%c0_7, %c0_8], %41 {strides = array<i32>} : memref<8x128xf32, #tpu.memory_space<vmem>>, vector<8x128xf32>,
    return
  }
  func.func @transform_0(%arg0: i32, %arg1: memref<8xi32, #tpu.memory_space<smem>>) -> (i32, i32) {
    %c0_i32 = arith.constant 0 : i32
    %c0_i32_0 = arith.constant 0 : i32
    %c0_i32_1 = arith.constant 0 : i32
    return %c0_i32, %c0_i32_0 : i32, i32
  }
  func.func @transform_1(%arg0: i32, %arg1: memref<8xi32, #tpu.memory_space<smem>>) -> (i32, i32) {
    %c0_i32 = arith.constant 0 : i32
    %c0_i32_0 = arith.constant 0 : i32
    return %arg0, %c0_i32 : i32, i32
  }
}

</mosaic_0001>

<bundles_post_ra>
// kernel: tpu_custom_call.1
= control target key start
LH: loop header
LB: loop body
LE: loop exit
PB: predicated region body
PF: predicated region fallthrough
CT: control target
= control target key end

     0   :  { %s248_s0 = inlined_call_operand.hbm [shape: s32[8], index: 0, kind: input, shape index: {}]   ;;  %s249_s1 = inlined_call_operand.hbm [shape: f32[64,128], index: 1, kind: input, shape index: {}]   ;;  %s250_s2 = inlined_call_operand.hbm [shape: f32[8,128], index: 2, kind: output, shape index: {}]  }
   0x1   :  { %s131_s11 = scalar_lea.hbm %s248_s0, 16 }
   0x2   :  { %p132_p0 = scmp.ne.s32.totalorder %s248_s0, %s131_s11  ;;  %p135_p1 = scmp.lt.u32.totalorder %s131_s11, %s248_s0 }
   0x4   :  { %p137_p2 = pnand %p135_p1, %p132_p0 }
   0x6   :  { %140 = shalt.err (!%p137_p2)  }
   0x7   :  { %s191_s16 = smov [#allocation3]  }
   0x8   :  { %8 = dma.hbm_to_smem %s248_s0, 16, %s191_s16, [#allocation2] }
   0x9   :  { %185 = dma.done.wait [#allocation2], 16 }
   0xa   :  { %186 = vsyncadd [#allocation2], 4294967280 }
   0xb   :  { %10 = sfence }
   0xc   :  { %11 = vsyncpa [#allocation5], 0 }
   0xd   :  { %12 = vsyncpa [#allocation6], 0  ;;  %s192_s19 = smov [#allocation4]   ;;  %s141_s23 = scalar_lea.hbm %s249_s1, 1024 }
   0xe   :  { %s18_s20 = sshll.u32 %s192_s19, 4  ;;  %p142_p3 = scmp.ne.s32.totalorder %s249_s1, %s141_s23  ;;  %s19_s20 = int_to_ptr.vmem [resolvable:$true] %s18_s20 }
   0xf   :  { %p145_p4 = scmp.lt.u32.totalorder %s141_s23, %s249_s1 }
  0x11   :  { %p147_p5 = pnand %p145_p4, %p142_p3 }
  0x13   :  { %150 = shalt.err (!%p147_p5)
}
  0x14   :  { %s151_s0 = scalar_lea.vmem %s19_s20, 1024  ;;  %p156_p7 = scmp.lt.s32.totalorder %s19_s20, %s19_s20 }
  0x15   :  { %p152_p6 = scmp.ne.s32.totalorder %s19_s20, %s151_s0  ;;  %p157_p8 = scmp.lt.s32.totalorder %s151_s0, %s151_s0 }
  0x17   :  { %p158_p9 = por %p157_p8, %p156_p7 }
  0x19   :  { %p159_p10 = pnand %p158_p9, %p152_p6 }
  0x1b   :  { %162 = shalt.err (!%p159_p10)
}
  0x1c   :  { %s193_s28 = smov 128   ;;  %s194_s29 = smov 8  }
  0x1d   :  { %24 = dma.hbm_to_vmem [thread:$0]  %s249_s1, 1024, %s19_s20, [#allocation5], %s193_s28, %s193_s28, %s194_s29  }
  0x1e   :  { %187 = dma.done.wait [#allocation5], 1024  }
  0x1f   :  { %188 = vsyncadd [#allocation5], 4294966272  ;;  %s29_s4 = sld [smem:[#allocation3]]  ;;  %s119_s5 = sld [smem:[#allocation3 + $0x1]]  ;;  %vm81_vm0 = vcmask 1040384   ;;  %vm83_vm1 = vcmask 1041408  }
  0x20   :  { %s120_s6 = sld [smem:[#allocation3 + $0x2]]  ;;  %s121_s7 = sld [smem:[#allocation3 + $0x3]]  ;;  %vm85_vm2 = vcmask 1042432   ;;  %vm87_vm3 = vcmask 1043456   ;;  %vm89_vm4 = vcmask 1044480   ;;  %vm91_vm5 = vcmask 1045504  }
  0x21   :  { %s122_s8 = sld [smem:[#allocation3 + $0x4]]  ;;  %s123_s9 = sld [smem:[#allocation3 + $0x5]]  ;;  %vm93_vm6 = vcmask 1046528  }
  0x22   :  { %s124_s10 = sld [smem:[#allocation3 + $0x6]]  ;;  %s125_s11 = sld [smem:[#allocation3 + $0x7]] }
  0x23   :  { %s195_s19 = smov [#allocation7]  }
  0x24   :  { %s102_s20 = sshll.u32 %s195_s19, 4  ;;  %s103_s20 = int_to_ptr.vmem [resolvable:$true] %s102_s20 }
  0x25   :  { %s30_s12 = scalar_lea.vmem [#allocation4], %s29_s4  ;;  %s34_s13 = scalar_lea.vmem [#allocation4], %s119_s5 }
  0x26   :  { %v31_v0 = vld [vmem:[%s30_s12] sm:$0x1]  ;;  %s38_s14 = scalar_lea.vmem [#allocation4], %s120_s6  ;;  %s42_s15 = scalar_lea.vmem [#allocation4], %s121_s7 }
  0x27   :  { %v35_v1 = vld [vmem:[%s34_s13] sm:$0x1]  ;;  %s46_s1 = scalar_lea.vmem [#allocation4], %s122_s8  ;;  %s50_s16 = scalar_lea.vmem [#allocation4], %s123_s9 }
  0x28   :  { %v39_v2 = vld [vmem:[%s38_s14] sm:$0x1]  ;;  %s54_s17 = scalar_lea.vmem [#allocation4], %s124_s10  ;;  %v61_v7 = vrot.slane %v35_v1, 7  ;;  %s58_s18 = scalar_lea.vmem [#allocation4], %s125_s11 }
  0x29   :  { %v43_v3 = vld [vmem:[%s42_s15] sm:$0x1]  ;;  %v64_v8 = vrot.slane %v39_v2, 6  ;;  %s163_s21 = scalar_lea.vmem %s103_s20, 128  ;;  %p168_p12 = scmp.lt.s32.totalorder %s103_s20, %s103_s20 }
  0x2a   :  { %v47_v4 = vld [vmem:[%s46_s1] sm:$0x1]  ;;  %v67_v10 = vrot.slane %v43_v3, 5  ;;  %v82_v13 = vsel %vm81_vm0, %v31_v0, %v61_v7  ;;  %p164_p11 = scmp.ne.s32.totalorder %s103_s20, %s163_s21  ;;  %p169_p13 = scmp.lt.s32.totalorder %s163_s21, %s163_s21 }
  0x2b   :  { %v51_v5 = vld [vmem:[%s50_s16] sm:$0x1]  ;;  %v70_v11 = vrot.slane %v47_v4, 4  ;;  %v84_v15 = vsel %vm83_vm1, %v82_v13, %v64_v8 }
  0x2c   :  { %v55_v6 = vld [vmem:[%s54_s17] sm:$0x1]  ;;  %v73_v12 = vrot.slane %v51_v5, 3  ;;  %v86_v17 = vsel %vm85_vm2, %v84_v15, %v67_v10  ;;  %p170_p0 = por %p169_p13, %p168_p12 }
  0x2d   :  { %v59_v9 = vld [vmem:[%s58_s18] sm:$0x1]  ;;  %v76_v14 = vrot.slane %v55_v6, 2  ;;  %v88_v18 = vsel %vm87_vm3, %v86_v17, %v70_v11 }
  0x2e   :  { %v79_v16 = vrot.slane %v59_v9, 1  ;;  %v90_v19 = vsel %vm89_vm4, %v88_v18, %v73_v12  ;;  %p171_p1 = pnand %p170_p0, %p164_p11 }
  0x2f   :  { %v92_v20 = vsel %vm91_vm5, %v90_v19, %v76_v14 }
  0x30   :  { %v94_v21 = vsel %vm93_vm6, %v92_v20, %v79_v16 }
  0x31   :  { %95 = vst [vmem:[#allocation7] sm:$0xff] %v94_v21 }
  0x32   :  { %174 = shalt.err (!%p171_p1)
}
  0x33   :  { %s175_s24 = scalar_lea.hbm %s250_s2, 128 }
  0x34   :  { %p176_p2 = scmp.ne.s32.totalorder %s250_s2, %s175_s24  ;;  %p179_p3 = scmp.lt.u32.totalorder %s175_s24, %s250_s2 }
  0x36   :  { %p181_p4 = pnand %p179_p3, %p176_p2 }
  0x38   :  { %184 = shalt.err (!%p181_p4)
}
  0x39   :  { %105 = dma.vmem_to_hbm [thread:$0]  %s103_s20, 128, %s250_s2, [#allocation6]  }
  0x3a   :  { %189 = dma.done.wait [#allocation6], 128  }
  0x3b   :  { %190 = vsyncadd [#allocation6], 4294967168 }
  0x3c   :  { %109 = vsyncpa [#allocation5], 1 }
  0x3d   :  { %110 = vsyncpa [#allocation6], 1 }

</bundles_post_ra>
